<compile_context>
chip_gen: v7x
topology: tpu7x:2x2x1
jax: 0.10.0
libtpu: 0.0.40
codegen_flags: <defaults>
</compile_context>

<pallas_src>
import jax
import jax.numpy as jnp
from jax.experimental import pallas as pl
from jax.experimental.pallas import tpu as pltpu

LANES = 128        # vreg lane width
SUBLANES = 8       # vreg sublane count (f32)
ALIGN = SUBLANES * LANES  # 1024: pad granularity for the flat input


def logreg_kernel(x_ref, nwb_ref, o_ref):
    # nwb = [-w, -b] lives in SMEM: loaded once on the scalar path, broadcast free.
    nw = nwb_ref[0]
    nb = nwb_ref[1]
    # exp(-(x*w + b)) = exp(x*(-w) + (-b)): one VPU fma + one EUP exp per vreg.
    t = jnp.exp(x_ref[...] * nw + nb)
    # Exact sigmoid; divide cost is hidden under the HBM-bound pipeline.
    o_ref[...] = 1.0 / (1.0 + t)


def logistic_regression(x, weight, bias, *, tile_rows=2048):
    """x: (B, 1) f32, weight: (1, 1) f32, bias: (1,) f32 -> sigmoid(x @ W^T + b).

    tile_rows: row-tile of the lane-dense (rows, 128) view.  Default 2048 gives a
    1 MiB block.  v7x: 8192 is a good choice (3.2 TB/s HBM, 32 MiB scoped VMEM);
    v5e: keep <= 4096 (16 MiB scoped-VMEM default).
    """
    B = x.shape[0]
    assert x.shape == (B, 1)

    # Pre-negated weight/bias packed into a single (2,) SMEM scalar array.
    nwb = jnp.stack([-weight.reshape(()), -bias.reshape(())]).astype(jnp.float32)

    # Lane-dense view: flatten and pad only to the next multiple of 8*128 so the
    # (rows, 128) array always has a multiple-of-8 sublane dim.  Padding is <= 1023
    # elements and is skipped (no HBM copy) when B is already aligned.
    x_flat = x.reshape(-1).astype(jnp.float32)
    pad = (-B) % ALIGN
    if pad:
        x_flat = jnp.pad(x_flat, (0, pad))  # padded tail computes sigmoid(b); sliced off below
    total = B + pad
    rows = total // LANES                   # multiple of 8, >= 8
    x2d = x_flat.reshape(rows, LANES)

    # Row-tile: multiple of 8, never larger than the array (ragged last tile is
    # handled by the grid).  NOTE: tr/rows depend on B, so distinct batch sizes
    # recompile; for serving, bucket B to a few padded sizes on the caller side.
    tr = max(SUBLANES, (min(tile_rows, rows) // SUBLANES) * SUBLANES)
    n_tiles = pl.cdiv(rows, tr)

    out = pl.pallas_call(
        logreg_kernel,
        out_shape=jax.ShapeDtypeStruct((rows, LANES), jnp.float32),
        grid=(n_tiles,),
        in_specs=[
            pl.BlockSpec((tr, LANES), lambda i: (i, 0)),            # x tile -> VMEM
            pl.BlockSpec(memory_space=pltpu.MemorySpace.SMEM),      # [-w, -b] scalars
        ],
        out_specs=pl.BlockSpec((tr, LANES), lambda i: (i, 0)),
        compiler_params=pltpu.CompilerParams(
            dimension_semantics=("parallel",)),                     # both TCs on v7x
    )(x2d, nwb)

    out_flat = out.reshape(-1)
    if pad:
        out_flat = out_flat[:B]   # drop <= 1023 padded tail elements
    return out_flat.reshape(B, 1)


if __name__ == "__main__":
    key = jax.random.PRNGKey(0)
    kw, kb, kx = jax.random.split(key, 3)

    # torch.nn.Linear(1, 1): weight/bias ~ U(-1, 1) (bound = 1/sqrt(in_features)).
    weight = jax.random.uniform(kw, (1, 1), jnp.float32, minval=-1.0, maxval=1.0)
    bias = jax.random.uniform(kb, (1,), jnp.float32, minval=-1.0, maxval=1.0)

    # Same input as the reference script: x_data = [[1.], [2.], [3.], [4.]]
    x = jnp.array([[1.0], [2.0], [3.0], [4.0]], dtype=jnp.float32)
    y_pred = logistic_regression(x, weight, bias)
    jax.block_until_ready(y_pred)
    y_ref = jax.nn.sigmoid(x @ weight + bias)
    assert y_pred.shape == y_ref.shape
    assert jnp.allclose(y_pred, y_ref, atol=1e-4, rtol=1e-4), (y_pred, y_ref)

    # Aligned batch (B % 1024 == 0): exercises the multi-tile grid, no pad / no slice copy.
    x_big = jax.random.normal(kx, (4096, 1), jnp.float32)
    y_big = logistic_regression(x_big, weight, bias, tile_rows=8)
    jax.block_until_ready(y_big)
    y_big_ref = jax.nn.sigmoid(x_big @ weight + bias)
    assert jnp.allclose(y_big, y_big_ref, atol=1e-4, rtol=1e-4)

    # Unaligned batch: exercises the minimal-pad + tail-slice path.
    x_odd = jax.random.normal(jax.random.PRNGKey(1), (1000, 1), jnp.float32)
    y_odd = logistic_regression(x_odd, weight, bias)
    jax.block_until_ready(y_odd)
    y_odd_ref = jax.nn.sigmoid(x_odd @ weight + bias)
    assert jnp.allclose(y_odd, y_odd_ref, atol=1e-4, rtol=1e-4)

    print("KERNEL_OK")
</pallas_src>

<mosaic_0001>
module attributes {stable_mosaic.version = 11 : i64} {
  func.func @logreg_kernel(%arg0: i32, %arg1: memref<8x128xf32, #tpu.memory_space<vmem>>, %arg2: memref<2xf32, #tpu.memory_space<smem>>, %arg3: memref<8x128xf32, #tpu.memory_space<vmem>>) attributes {dimension_semantics = [#tpu.dimension_semantics<parallel>], iteration_bounds = array<i64: 1>, scalar_prefetch = 0 : i64, scratch_operands = 0 : i64, tpu.core_type = #tpu.core_type<tc>, window_params = [{transform_indices = @transform_0, window_bounds = array<i64: 8, 128>}, {transform_indices = @transform_1, window_bounds = array<i64: 2>}, {transform_indices = @transform_2, window_bounds = array<i64: 8, 128>}]} {
    %c0 = arith.constant 0 : index
    %0 = memref.load %arg2[%c0] : memref<2xf32, #tpu.memory_space<smem>>
    %c1 = arith.constant 1 : index
    %1 = memref.load %arg2[%c1] : memref<2xf32, #tpu.memory_space<smem>>
    %c0_0 = arith.constant 0 : index
    %c0_1 = arith.constant 0 : index
    %2 = vector.load %arg1[%c0_0, %c0_1] : memref<8x128xf32, #tpu.memory_space<vmem>>, vector<8x128xf32>
    %3 = vector.broadcast %0 : f32 to vector<8x128xf32>
    %4 = arith.mulf %2, %3 : vector<8x128xf32>
    %5 = vector.broadcast %1 : f32 to vector<8x128xf32>
    %6 = arith.addf %4, %5 : vector<8x128xf32>
    %7 = math.exp %6 : vector<8x128xf32>
    %cst = arith.constant 1.000000e+00 : f32
    %8 = vector.broadcast %cst : f32 to vector<8x128xf32>
    %9 = arith.addf %8, %7 : vector<8x128xf32>
    %cst_2 = arith.constant 1.000000e+00 : f32
    %10 = vector.broadcast %cst_2 : f32 to vector<8x128xf32>
    %11 = arith.divf %10, %9 : vector<8x128xf32>
    %c0_3 = arith.constant 0 : index
    %c0_4 = arith.constant 0 : index
    %12 = vector.load %arg3[%c0_3, %c0_4] : memref<8x128xf32, #tpu.memory_space<vmem>>, vector<8x128xf32>
    tpu.vector_store %arg3[%c0_3, %c0_4], %11 {strides = array<i32>} : memref<8x128xf32, #tpu.memory_space<vmem>>, vector<8x128xf32>,
    return
  }
  func.func @transform_0(%arg0: i32) -> (i32, i32) {
    %c0_i32 = arith.constant 0 : i32
    %c0_i32_0 = arith.constant 0 : i32
    return %arg0, %c0_i32 : i32, i32
  }
  func.func @transform_1(%arg0: i32) -> i32 {
    %c0_i32 = arith.constant 0 : i32
    %c0_i32_0 = arith.constant 0 : i32
    return %c0_i32 : i32
  }
  func.func @transform_2(%arg0: i32) -> (i32, i32) {
    %c0_i32 = arith.constant 0 : i32
    %c0_i32_0 = arith.constant 0 : i32
    return %arg0, %c0_i32 : i32, i32
  }
}

</mosaic_0001>

<bundles_post_ra>
// kernel: tpu_custom_call.1
= control target key start
LH: loop header
LB: loop body
LE: loop exit
PB: predicated region body
PF: predicated region fallthrough
CT: control target
= control target key end

     0   :  { %7 = vsyncpa [#allocation3], 0  ;;  %s181_s0 = inlined_call_operand.hbm [shape: f32[8,128], index: 0, kind: input, shape index: {}]   ;;  %s182_s1 = inlined_call_operand.vmem [shape: f32[2], index: 1, kind: input, shape index: {}]   ;;  %s183_s2 = inlined_call_operand.hbm [shape: f32[8,128], index: 2, kind: output, shape index: {}]  }
   0x1   :  { %8 = vsyncpa [#allocation5], 0 }
   0x2   :  { %9 = vsyncpa [#allocation4], 0  ;;  %s26_s11 = sshll.u32 %s182_s1, 4  ;;  %s136_s12 = smov [#allocation2]   ;;  %s27_s11 = int_to_ptr.vmem [resolvable:$true] %s26_s11 }
   0x3   :  { %s16_s13 = sshll.u32 %s136_s12, 4  ;;  %s74_s16 = scalar_lea.hbm %s181_s0, 128  ;;  %s17_s13 = int_to_ptr.vmem [resolvable:$true] %s16_s13 }
   0x4   :  { %p75_p0 = scmp.ne.s32.totalorder %s181_s0, %s74_s16  ;;  %p78_p1 = scmp.lt.u32.totalorder %s74_s16, %s181_s0 }
   0x6   :  { %p80_p2 = pnand %p78_p1, %p75_p0 }
   0x8   :  { %83 = shalt.err (!%p80_p2)
}
   0x9   :  { %s84_s21 = scalar_lea.vmem %s17_s13, 128  ;;  %p89_p4 = scmp.lt.s32.totalorder %s17_s13, %s17_s13 }
   0xa   :  { %p85_p3 = scmp.ne.s32.totalorder %s17_s13, %s84_s21  ;;  %p90_p5 = scmp.lt.s32.totalorder %s84_s21, %s84_s21 }
   0xc   :  { %p91_p6 = por %p90_p5, %p89_p4 }
   0xe   :  { %p92_p7 = pnand %p91_p6, %p85_p3 }
  0x10   :  { %95 = shalt.err (!%p92_p7)
}
  0x11   :  { %19 = dma.hbm_to_vmem [thread:$0]  %s181_s0, 128, %s17_s13, [#allocation3]  }
  0x12   :  { %s96_s23 = scalar_lea.vmem %s27_s11, 16  ;;  %p101_p9 = scmp.lt.s32.totalorder %s27_s11, %s27_s11 }
  0x13   :  { %p97_p8 = scmp.ne.s32.totalorder %s27_s11, %s96_s23  ;;  %p102_p10 = scmp.lt.s32.totalorder %s96_s23, %s96_s23 }
  0x15   :  { %p103_p11 = por %p102_p10, %p101_p9 }
  0x17   :  { %p104_p12 = pnand %p103_p11, %p97_p8 }
  0x19   :  { %107 = shalt.err (!%p104_p12)
}
  0x1a   :  { %s137_s24 = smov [#allocation6]  }
  0x1b   :  { %29 = dma.vmem_to_smem %s27_s11, 16, %s137_s24, [#allocation5]  }
  0x1c   :  { %130 = dma.done.wait [#allocation3], 128  }
  0x1d   :  { %131 = vsyncadd [#allocation3], 4294967168 }
  0x1e   :  { %132 = dma.done.wait [#allocation5], 16  }
  0x1f   :  { %133 = vsyncadd [#allocation5], 4294967280 }
  0x20   :  { %36 = sfence }
  0x21   :  { %s37_s25 = sld [smem:[#allocation6]]  ;;  %s66_s26 = sld [smem:[#allocation6 + $0x1]]  ;;  %v39_v0 = vld [vmem:[#allocation2] sm:$0xff] }
  0x22   :  { %s138_s0 = smov [#allocation7]  }
  0x23   :  { %s56_s27 = sshll.u32 %s138_s0, 4  ;;  %s57_s27 = int_to_ptr.vmem [resolvable:$true] %s56_s27 }
  0x24   :  { %s108_s28 = scalar_lea.vmem %s57_s27, 128  ;;  %p113_p0 = scmp.lt.s32.totalorder %s57_s27, %s57_s27 }
  0x25   :  { %p109_p13 = scmp.ne.s32.totalorder %s57_s27, %s108_s28  ;;  %p114_p1 = scmp.lt.s32.totalorder %s108_s28, %s108_s28 }
  0x27   :  { %v40_v1 = vstv %s37_s25  ;;  %v42_v2 = vstv %s66_s26  ;;  %p115_p2 = por %p114_p1, %p113_p0 }
  0x28   :  { %v41_v3 = vmul.f32 %v40_v1, %v39_v0 }
  0x29   :  { %p116_p3 = pnand %p115_p2, %p109_p13 }
  0x2a   :  { %v43_v4 = vadd.f32 %v42_v2, %v41_v3 }
  0x2c   :  { %v44_v5 = vmul.f32 1.442695, %v43_v4 }
  0x2e   :  { %70 = vpow2.f32 %v44_v5 }
  0x38   :  { %v71_v6 = vpop.eup %70 }
  0x39   :  { %v46_v7 = vadd.f32 1.0, %v71_v6 }
  0x3b   :  { %72 = vrcp.f32 %v46_v7 }
  0x45   :  { %v73_v8 = vpop.eup %72 }
  0x46   :  { %49 = vst [vmem:[#allocation7] sm:$0xff] %v73_v8 }
  0x47   :  { %119 = shalt.err (!%p116_p3)
}
  0x48   :  { %s120_s3 = scalar_lea.hbm %s183_s2, 128 }
  0x49   :  { %p121_p4 = scmp.ne.s32.totalorder %s183_s2, %s120_s3  ;;  %p124_p5 = scmp.lt.u32.totalorder %s120_s3, %s183_s2 }
  0x4b   :  { %p126_p6 = pnand %p124_p5, %p121_p4 }
  0x4d   :  { %129 = shalt.err (!%p126_p6)
}
  0x4e   :  { %59 = dma.vmem_to_hbm [thread:$0]  %s57_s27, 128, %s183_s2, [#allocation4]  }
  0x4f   :  { %134 = dma.done.wait [#allocation4], 128  }
  0x50   :  { %135 = vsyncadd [#allocation4], 4294967168 }
  0x51   :  { %63 = vsyncpa [#allocation3], 1 }
  0x52   :  { %64 = vsyncpa [#allocation4], 1 }
  0x53   :  { %65 = vsyncpa [#allocation5], 1 }

</bundles_post_ra>
